<compile_context>
chip_gen: v7x
topology: tpu7x:2x2x1
jax: 0.10.0
libtpu: 0.0.40
codegen_flags: <defaults>
</compile_context>

<pallas_src>
import math
from functools import partial

import jax
import jax.numpy as jnp
from jax.experimental import pallas as pl
from jax.experimental.pallas import tpu as pltpu


def _pick_tile(n, pref):
    """Largest of {pref, pref/2, pref/4} that divides n, else the full dim."""
    if n <= pref:
        return n
    for t in (pref, pref // 2, pref // 4):
        if t > 0 and n % t == 0:
            return t
    # TODO(synk): masked epilogue for extents that do not divide the preferred tiles.
    return n


# ----------------------------- Linear projection -----------------------------

def _linear_kernel(x_ref, w_ref, b_ref, o_ref, *, compute_dtype):
    # x: (TM, Din), w: (Din, TN), b: (1, TN)  ->  o: (TM, TN)
    x = x_ref[...].astype(compute_dtype)
    w = w_ref[...].astype(compute_dtype)
    acc = jnp.dot(x, w, preferred_element_type=jnp.float32)
    o_ref[...] = (acc + b_ref[...].astype(jnp.float32)).astype(o_ref.dtype)


def pallas_linear(x2d, w, b, *, tile_m=512, tile_n=1024,
                  compute_dtype=jnp.float32):
    """y = x @ w + b ; w stored (Din, Dout).

    Grid = (Dout tiles, row tiles); rows iterate fastest so the weight column
    slab stays resident while activation/output tiles stream through.
    """
    R, Din = x2d.shape
    Dout = w.shape[1]
    TM = _pick_tile(R, tile_m)
    TN = _pick_tile(Dout, tile_n)
    grid = (pl.cdiv(Dout, TN), pl.cdiv(R, TM))

    xi = jnp.dtype(x2d.dtype).itemsize
    wi = jnp.dtype(w.dtype).itemsize
    est = 2 * (TM * Din * xi + Din * TN * wi + TM * TN * xi + TN * 4)
    vmem_limit = int(min(max(2 * est, 32 << 20), 64 << 20))

    kernel = partial(_linear_kernel, compute_dtype=compute_dtype)
    return pl.pallas_call(
        kernel,
        out_shape=jax.ShapeDtypeStruct((R, Dout), x2d.dtype),
        grid=grid,
        in_specs=[
            pl.BlockSpec((TM, Din), lambda j, i: (i, 0)),
            pl.BlockSpec((Din, TN), lambda j, i: (0, j)),   # resident across row tiles
            pl.BlockSpec((1, TN), lambda j, i: (0, j)),
        ],
        out_specs=pl.BlockSpec((TM, TN), lambda j, i: (i, j)),
        compiler_params=pltpu.CompilerParams(
            dimension_semantics=("parallel", "parallel"),
            vmem_limit_bytes=vmem_limit),
    )(x2d, w, b.reshape(1, Dout))


# ------------------------------ Attention kernel ------------------------------

def _attn_body(q_ref, k_ref, v_ref, mask, o_ref, m_sc, l_sc, acc_sc, *,
               n_heads, d_keys, scale, compute_dtype):
    si = pl.program_id(2)
    _, TL, D = q_ref.shape
    TS = k_ref.shape[1]
    H, dk = n_heads, d_keys

    @pl.when(si == 0)
    def _init():
        m_sc[...] = jnp.full(m_sc.shape, -jnp.inf, jnp.float32)
        l_sc[...] = jnp.zeros(l_sc.shape, jnp.float32)
        acc_sc[...] = jnp.zeros(acc_sc.shape, jnp.float32)

    # One head-split relayout per operand per grid step (amortized over all heads)
    # instead of 3*H lane-axis slices; heads become the batch dim of batched einsums.
    q3 = jnp.swapaxes(q_ref[0].astype(compute_dtype).reshape(TL, H, dk), 0, 1)
    k3 = jnp.swapaxes(k_ref[0].astype(compute_dtype).reshape(TS, H, dk), 0, 1)
    v3 = jnp.swapaxes(v_ref[0].astype(compute_dtype).reshape(TS, H, dk), 0, 1)

    # scores = q @ k^T per head, contracted over d_keys (no explicit k transpose).
    s = jnp.einsum('hld,hsd->hls', q3, k3, preferred_element_type=jnp.float32)
    if mask is not None:
        # masked_fill(-1e9) BEFORE the scale, exactly as in the PyTorch module.
        s = jnp.where(mask != 0, jnp.float32(-1.0e9), s)
    s = s * jnp.float32(scale)

    # Online softmax update (m/l/acc persist across the S grid axis).
    m_prev = m_sc[...]
    m_new = jnp.maximum(m_prev, jnp.max(s, axis=-1, keepdims=True))
    alpha = jnp.exp(m_prev - m_new)
    p = jnp.exp(s - m_new)
    l_sc[...] = alpha * l_sc[...] + jnp.sum(p, axis=-1, keepdims=True)
    acc_sc[...] = alpha * acc_sc[...] + jnp.einsum(
        'hls,hsd->hld', p.astype(compute_dtype), v3,
        preferred_element_type=jnp.float32)
    m_sc[...] = m_new

    @pl.when(si == pl.num_programs(2) - 1)
    def _finalize():
        inv = pl.reciprocal(l_sc[...], approx=False)      # exact; EUP slot
        out = acc_sc[...] * inv                           # (H, TL, dk)
        out = jnp.swapaxes(out, 0, 1).reshape(TL, D)      # single lane-dense write
        o_ref[0] = out.astype(o_ref.dtype)


def _attn_kernel_nomask(q_ref, k_ref, v_ref, o_ref, m_sc, l_sc, acc_sc, **kw):
    _attn_body(q_ref, k_ref, v_ref, None, o_ref, m_sc, l_sc, acc_sc, **kw)


def _attn_kernel_masked(q_ref, k_ref, v_ref, m_ref, o_ref, m_sc, l_sc, acc_sc,
                        **kw):
    _attn_body(q_ref, k_ref, v_ref, m_ref[0], o_ref, m_sc, l_sc, acc_sc, **kw)


def pallas_attention(q, k, v, *, n_heads, scale, mask=None,
                     compute_dtype=jnp.float32, tile_l=256, tile_s=512):
    """q:(B,L,D) k,v:(B,S,D) head-merged; mask: None or int8 (B, 1|H, L, S)."""
    B, L, D = q.shape
    S = k.shape[1]
    d_keys = D // n_heads
    TL = _pick_tile(L, tile_l)
    TS = _pick_tile(S, tile_s)
    grid = (B, L // TL, S // TS)

    isz = jnp.dtype(q.dtype).itemsize
    est = 2 * isz * (2 * TL * D + 2 * TS * D)                    # q, out, k, v (dbl buf)
    est += 3 * n_heads * TL * TS * 4                             # live s / p tensors
    est += n_heads * TL * (d_keys + 2) * 4                       # m/l/acc scratch
    if mask is not None:
        est += 2 * mask.shape[1] * TL * TS
    vmem_limit = int(min(max(2 * est, 32 << 20), 64 << 20))

    flops = 4 * B * n_heads * L * S * d_keys                     # two matmuls / head
    transcendentals = B * n_heads * L * S                        # exp
    bytes_accessed = (q.size + k.size + v.size + B * L * D) * isz
    if mask is not None:
        bytes_accessed += mask.size * jnp.dtype(mask.dtype).itemsize
    cost = pl.CostEstimate(flops=flops, transcendentals=transcendentals,
                           bytes_accessed=bytes_accessed)

    common = dict(n_heads=n_heads, d_keys=d_keys, scale=scale,
                  compute_dtype=compute_dtype)
    if mask is None:
        kernel = partial(_attn_kernel_nomask, **common)
        in_specs = [
            pl.BlockSpec((1, TL, D), lambda b, li, si: (b, li, 0)),
            pl.BlockSpec((1, TS, D), lambda b, li, si: (b, si, 0)),
            pl.BlockSpec((1, TS, D), lambda b, li, si: (b, si, 0)),
        ]
        operands = (q, k, v)
    else:
        HM = mask.shape[1]                 # 1 (head-invariant) or n_heads (per-head)
        kernel = partial(_attn_kernel_masked, **common)
        in_specs = [
            pl.BlockSpec((1, TL, D), lambda b, li, si: (b, li, 0)),
            pl.BlockSpec((1, TS, D), lambda b, li, si: (b, si, 0)),
            pl.BlockSpec((1, TS, D), lambda b, li, si: (b, si, 0)),
            pl.BlockSpec((1, HM, TL, TS), lambda b, li, si: (b, 0, li, si)),
        ]
        operands = (q, k, v, mask)

    # NOTE: for real deployments keep D a multiple of 128 so output stores are
    # unmasked lane-dense vst; the demo's D=32 forces masked partial stores.
    return pl.pallas_call(
        kernel,
        out_shape=jax.ShapeDtypeStruct((B, L, D), q.dtype),
        grid=grid,
        in_specs=in_specs,
        out_specs=pl.BlockSpec((1, TL, D), lambda b, li, si: (b, li, 0)),
        scratch_shapes=[
            pltpu.VMEM((n_heads, TL, 1), jnp.float32),        # running max
            pltpu.VMEM((n_heads, TL, 1), jnp.float32),        # running sum
            pltpu.VMEM((n_heads, TL, d_keys), jnp.float32),   # output accumulator
        ],
        compiler_params=pltpu.CompilerParams(
            dimension_semantics=("parallel", "parallel", "arbitrary"),
            vmem_limit_bytes=vmem_limit),
        cost_estimate=cost,
    )(*operands)


# ------------------------------ Module wrapper --------------------------------

def _normalize_mask(attn_mask, B, H, L, S):
    """-> None or int8 (B, 1|H, L, S); per-head masks are preserved."""
    if attn_mask is None:
        return None
    m = jnp.asarray(attn_mask)
    if m.ndim == 2:                          # (L, S)
        m = m[None, None]
    elif m.ndim == 3:                        # (B, L, S)
        m = m[:, None]
    hm = m.shape[1]
    m = jnp.broadcast_to(m, (B, hm, L, S))
    return (m != 0).astype(jnp.int8)


class ProbSparseAttentionPallas:
    """JAX/Pallas port of the PyTorch ProbSparseAttention forward (eval mode)."""

    def __init__(self, d_model, n_heads, dropout=0.1, key=None,
                 compute_dtype=jnp.float32):
        assert d_model % n_heads == 0
        self.d_model = d_model
        self.n_heads = n_heads
        self.d_keys = d_model // n_heads
        self.scale = self.d_keys ** (-0.5)
        # bf16 MXU operands (f32 accumulation) recommended on v6e/v7x; keep f32
        # elementwise math regardless (mandatory on v5e: no bf16 VPU/EUP).
        self.compute_dtype = compute_dtype
        # nn.Dropout is identity at inference; reproduced as identity.

        if key is None:
            key = jax.random.PRNGKey(0)
        ks = jax.random.split(key, 8)
        bound = 1.0 / math.sqrt(d_model)

        def init_w(k):
            # stored as (Din, Dout) so kernels compute x @ W directly
            return jax.random.uniform(k, (d_model, d_model), jnp.float32,
                                      -bound, bound)

        def init_b(k):
            return jax.random.uniform(k, (d_model,), jnp.float32, -bound, bound)

        self.Wq, self.bq = init_w(ks[0]), init_b(ks[1])
        self.Wk, self.bk = init_w(ks[2]), init_b(ks[3])
        self.Wv, self.bv = init_w(ks[4]), init_b(ks[5])
        self.Wo, self.bo = init_w(ks[6]), init_b(ks[7])
        # Fused projection weights (one HBM read of the activation, one dispatch).
        self.Wqkv = jnp.concatenate([self.Wq, self.Wk, self.Wv], axis=1)
        self.bqkv = jnp.concatenate([self.bq, self.bk, self.bv], axis=0)
        self.Wkv = jnp.concatenate([self.Wk, self.Wv], axis=1)
        self.bkv = jnp.concatenate([self.bk, self.bv], axis=0)

    def __call__(self, queries, keys, values, attn_mask=None):
        B, L, D = queries.shape
        S = keys.shape[1]
        cd = self.compute_dtype

        if queries is keys and keys is values:
            # Self-attention: fused Q/K/V projection with the (D, 3D) weight.
            qkv = pallas_linear(queries.reshape(B * L, D), self.Wqkv, self.bqkv,
                                compute_dtype=cd)
            q = qkv[:, :D].reshape(B, L, D)
            k = qkv[:, D:2 * D].reshape(B, S, D)
            v = qkv[:, 2 * D:].reshape(B, S, D)
        else:
            q = pallas_linear(queries.reshape(B * L, D), self.Wq, self.bq,
                              compute_dtype=cd).reshape(B, L, D)
            if keys is values:
                kv = pallas_linear(keys.reshape(B * S, D), self.Wkv, self.bkv,
                                   compute_dtype=cd)
                k = kv[:, :D].reshape(B, S, D)
                v = kv[:, D:].reshape(B, S, D)
            else:
                k = pallas_linear(keys.reshape(B * S, D), self.Wk, self.bk,
                                  compute_dtype=cd).reshape(B, S, D)
                v = pallas_linear(values.reshape(B * S, D), self.Wv, self.bv,
                                  compute_dtype=cd).reshape(B, S, D)

        mask = _normalize_mask(attn_mask, B, self.n_heads, L, S)
        o = pallas_attention(q, k, v, n_heads=self.n_heads, scale=self.scale,
                             mask=mask, compute_dtype=cd)
        return pallas_linear(o.reshape(B * L, D), self.Wo, self.bo,
                             compute_dtype=cd).reshape(B, L, D)

    # Pure-JAX reference for correctness checking.
    def reference(self, queries, keys, values, attn_mask=None):
        B, L, D = queries.shape
        S = keys.shape[1]
        H, dk = self.n_heads, self.d_keys
        q = (queries.reshape(B * L, D) @ self.Wq + self.bq).reshape(B, L, H, dk)
        k = (keys.reshape(B * S, D) @ self.Wk + self.bk).reshape(B, S, H, dk)
        v = (values.reshape(B * S, D) @ self.Wv + self.bv).reshape(B, S, H, dk)
        scores = jnp.einsum('blhe,bshe->bhls', q, k)
        m = _normalize_mask(attn_mask, B, H, L, S)
        if m is not None:
            scores = jnp.where(m != 0, -1.0e9, scores)
        attn = jax.nn.softmax(scores * self.scale, axis=-1)
        V = jnp.einsum('bhls,bshe->blhe', attn, v).reshape(B, L, D)
        return (V.reshape(B * L, D) @ self.Wo + self.bo).reshape(B, L, D)


# ----------------------------------- Main --------------------------------------

if __name__ == "__main__":
    B, L, S, d_model, n_heads = 2, 8, 8, 32, 4

    root = jax.random.PRNGKey(0)
    k_params, k_q, k_k, k_v = jax.random.split(root, 4)

    module = ProbSparseAttentionPallas(d_model, n_heads, dropout=0.1, key=k_params)

    queries = jax.random.normal(k_q, (B, L, d_model), jnp.float32)
    keys = jax.random.normal(k_k, (B, S, d_model), jnp.float32)
    values = jax.random.normal(k_v, (B, S, d_model), jnp.float32)

    # 1) Cross-attention (distinct q/k/v), no mask, f32 compute.
    out = jax.block_until_ready(module(queries, keys, values, attn_mask=None))
    ref = module.reference(queries, keys, values, attn_mask=None)
    assert out.shape == (B, L, d_model)
    assert jnp.allclose(out, ref, atol=1e-3, rtol=1e-3), "mismatch (no mask)"

    # 2) Self-attention (exercises the fused QKV projection) with a causal mask.
    causal = jnp.triu(jnp.ones((L, L), jnp.bool_), k=1)
    out_m = jax.block_until_ready(module(queries, queries, queries,
                                         attn_mask=causal))
    ref_m = module.reference(queries, queries, queries, attn_mask=causal)
    assert jnp.allclose(out_m, ref_m, atol=1e-3, rtol=1e-3), "mismatch (masked)"

    # 3) bf16 MXU operands (f32 accumulation) -- the recommended v6e/v7x setting.
    module_bf16 = ProbSparseAttentionPallas(d_model, n_heads, dropout=0.1,
                                            key=k_params,
                                            compute_dtype=jnp.bfloat16)
    out_bf = jax.block_until_ready(module_bf16(queries, keys, values))
    assert jnp.allclose(out_bf, ref, atol=1e-1, rtol=1e-1), "mismatch (bf16)"

    print("KERNEL_OK")
</pallas_src>

<mosaic_0001>
module attributes {stable_mosaic.version = 11 : i64} {
  func.func @_linear_kernel(%arg0: i32, %arg1: i32, %arg2: memref<16x32xf32, #tpu.memory_space<vmem>>, %arg3: memref<32x32xf32, #tpu.memory_space<vmem>>, %arg4: memref<1x32xf32, #tpu.memory_space<vmem>>, %arg5: memref<16x32xf32, #tpu.memory_space<vmem>>) attributes {dimension_semantics = [#tpu.dimension_semantics<parallel>, #tpu.dimension_semantics<parallel>], iteration_bounds = array<i64: 1, 1>, scalar_prefetch = 0 : i64, scratch_operands = 0 : i64, tpu.core_type = #tpu.core_type<tc>, window_params = [{transform_indices = @transform_0, window_bounds = array<i64: 16, 32>}, {transform_indices = @transform_1, window_bounds = array<i64: 32, 32>}, {transform_indices = @transform_2, window_bounds = array<i64: 1, 32>}, {transform_indices = @transform_3, window_bounds = array<i64: 16, 32>}]} {
    %c0 = arith.constant 0 : index
    %c0_0 = arith.constant 0 : index
    %0 = vector.load %arg2[%c0, %c0_0] : memref<16x32xf32, #tpu.memory_space<vmem>>, vector<16x32xf32>
    %c0_1 = arith.constant 0 : index
    %c0_2 = arith.constant 0 : index
    %1 = vector.load %arg3[%c0_1, %c0_2] : memref<32x32xf32, #tpu.memory_space<vmem>>, vector<32x32xf32>
    %cst = arith.constant dense<0.000000e+00> : vector<16x32xf32>
    %2 = tpu.matmul %0, %1, %cst {dimension_numbers = #tpu.dot_dimension_numbers<[1], [0], [0], [1], [0, 0, 1, 1], [], []>} : vector<16x32xf32>, vector<32x32xf32>, vector<16x32xf32> -> vector<16x32xf32>
    %c0_3 = arith.constant 0 : index
    %c0_4 = arith.constant 0 : index
    %3 = vector.load %arg4[%c0_3, %c0_4] : memref<1x32xf32, #tpu.memory_space<vmem>>, vector<1x32xf32>
    %4 = vector.broadcast %3 : vector<1x32xf32> to vector<16x32xf32>
    %5 = arith.addf %2, %4 : vector<16x32xf32>
    %c0_5 = arith.constant 0 : index
    %c0_6 = arith.constant 0 : index
    %6 = vector.load %arg5[%c0_5, %c0_6] : memref<16x32xf32, #tpu.memory_space<vmem>>, vector<16x32xf32>
    tpu.vector_store %arg5[%c0_5, %c0_6], %5 {strides = array<i32>} : memref<16x32xf32, #tpu.memory_space<vmem>>, vector<16x32xf32>,
    return
  }
  func.func @transform_0(%arg0: i32, %arg1: i32) -> (i32, i32) {
    %c0_i32 = arith.constant 0 : i32
    %c0_i32_0 = arith.constant 0 : i32
    return %arg1, %c0_i32 : i32, i32
  }
  func.func @transform_1(%arg0: i32, %arg1: i32) -> (i32, i32) {
    %c0_i32 = arith.constant 0 : i32
    %c0_i32_0 = arith.constant 0 : i32
    return %c0_i32, %arg0 : i32, i32
  }
  func.func @transform_2(%arg0: i32, %arg1: i32) -> (i32, i32) {
    %c0_i32 = arith.constant 0 : i32
    %c0_i32_0 = arith.constant 0 : i32
    return %c0_i32, %arg0 : i32, i32
  }
  func.func @transform_3(%arg0: i32, %arg1: i32) -> (i32, i32) {
    %c0_i32 = arith.constant 0 : i32
    return %arg1, %arg0 : i32, i32
  }
}

</mosaic_0001>

<bundles_post_ra>
// kernel: tpu_custom_call.1
= control target key start
LH: loop header
LB: loop body
LE: loop exit
PB: predicated region body
PF: predicated region fallthrough
CT: control target
= control target key end

     0   :  { %8 = vsyncpa [#allocation3], 0  ;;  %s340_s0 = inlined_call_operand.hbm [shape: f32[16,32], index: 0, kind: input, shape index: {}]   ;;  %s341_s1 = inlined_call_operand.hbm [shape: f32[32,32], index: 1, kind: input, shape index: {}]   ;;  %s342_s2 = inlined_call_operand.vmem [shape: f32[1,32], index: 2, kind: input, shape index: {}]   ;;  %s343_s3 = inlined_call_operand.hbm [shape: f32[16,32], index: 3, kind: output, shape index: {}]  }
   0x1   :  { %9 = vsyncpa [#allocation6], 0 }
   0x2   :  { %10 = vsyncpa [#allocation4], 0  ;;  %s263_s12 = smov [#allocation2]   ;;  %s191_s16 = scalar_lea.hbm %s340_s0, 256 }
   0x3   :  { %s16_s13 = sshll.u32 %s263_s12, 4  ;;  %p192_p0 = scmp.ne.s32.totalorder %s340_s0, %s191_s16  ;;  %s17_s13 = int_to_ptr.vmem [resolvable:$true] %s16_s13 }
   0x4   :  { %p195_p1 = scmp.lt.u32.totalorder %s191_s16, %s340_s0 }
   0x6   :  { %p197_p2 = pnand %p195_p1, %p192_p0 }
   0x8   :  { %200 = shalt.err (!%p197_p2)
}
   0x9   :  { %s201_s21 = scalar_lea.vmem %s17_s13, 256  ;;  %p206_p4 = scmp.lt.s32.totalorder %s17_s13, %s17_s13 }
   0xa   :  { %p202_p3 = scmp.ne.s32.totalorder %s17_s13, %s201_s21  ;;  %p207_p5 = scmp.lt.s32.totalorder %s201_s21, %s201_s21 }
   0xc   :  { %p208_p6 = por %p207_p5, %p206_p4 }
   0xe   :  { %p209_p7 = pnand %p208_p6, %p202_p3 }
  0x10   :  { %212 = shalt.err (!%p209_p7)
}
  0x11   :  { %s264_s22 = smov 128   ;;  %s265_s23 = smov 8  }
  0x12   :  { %22 = dma.hbm_to_vmem [thread:$0]  %s340_s0, 256, %s17_s13, [#allocation3], %s264_s22, %s264_s22, %s265_s23  }
  0x13   :  { %s266_s26 = smov [#allocation5]   ;;  %s213_s30 = scalar_lea.hbm %s341_s1, 512 }
  0x14   :  { %s28_s27 = sshll.u32 %s266_s26, 4  ;;  %p214_p8 = scmp.ne.s32.totalorder %s341_s1, %s213_s30  ;;  %s29_s27 = int_to_ptr.vmem [resolvable:$true] %s28_s27 }
  0x15   :  { %p217_p9 = scmp.lt.u32.totalorder %s213_s30, %s341_s1 }
  0x17   :  { %p219_p10 = pnand %p217_p9, %p214_p8 }
  0x19   :  { %222 = shalt.err (!%p219_p10)
}
  0x1a   :  { %s223_s8 = scalar_lea.vmem %s29_s27, 512  ;;  %p228_p12 = scmp.lt.s32.totalorder %s29_s27, %s29_s27 }
  0x1b   :  { %p224_p11 = scmp.ne.s32.totalorder %s29_s27, %s223_s8  ;;  %p229_p13 = scmp.lt.s32.totalorder %s223_s8, %s223_s8 }
  0x1d   :  { %p230_p0 = por %p229_p13, %p228_p12 }
  0x1f   :  { %p231_p1 = pnand %p230_p0, %p224_p11 }
  0x21   :  { %234 = shalt.err (!%p231_p1)
}
  0x22   :  { %34 = dma.hbm_to_vmem [thread:$0]  %s341_s1, 512, %s29_s27, [#allocation6], %s264_s22, %s264_s22, %s265_s23  }
  0x23   :  { %257 = dma.done.wait [#allocation3], 256  }
  0x24   :  { %258 = vsyncadd [#allocation3], 4294967040 }
  0x25   :  { %259 = dma.done.wait [#allocation6], 512  }
  0x26   :  { %260 = vsyncadd [#allocation6], 4294966784  ;;  %vm56_vm0 = vcmask 261120   ;;  %v45_v0 = vld [vmem:[#allocation5] sm:$0xff]  ;;  %v46_v1 = vld [vmem:[#allocation5 + $0x8] sm:$0xff]  ;;  %s267_s11 = smov [#allocation7]  }
  0x27   :  { %v47_v2 = vld [vmem:[#allocation5 + $0x10] sm:$0xff]  ;;  %v178_v3 = vpack.c.bf16 %v46_v1, %v45_v0  ;;  %v48_v4 = vld [vmem:[#allocation5 + $0x18] sm:$0xff]  ;;  %s145_s12 = sshll.u32 %s267_s11, 4  ;;  %s146_s12 = int_to_ptr.vmem [resolvable:$true] %s145_s12 }
  0x28   :  { %v43_v5 = vld [vmem:[#allocation2] sm:$0xff]  ;;  %v182_v6 = vpack.c.bf16 %v48_v4, %v47_v2  ;;  %v44_v7 = vld [vmem:[#allocation2 + $0x8] sm:$0xff]  ;;  %s235_s13 = scalar_lea.vmem %s146_s12, 256  ;;  %p240_p3 = scmp.lt.s32.totalorder %s146_s12, %s146_s12 }
  0x29   :  { %175 = vmatprep.mubr.msk.f32.mxu0 %vm56_vm0, %v43_v5  ;;  %179 = vmatprep.subr.bf16.mxu0 %v178_v3  ;;  %v158_v8 = vld [vmem:[%s342_s2] ss:$0 sm:$0xff]  ;;  %p236_p2 = scmp.ne.s32.totalorder %s146_s12, %s235_s13  ;;  %p241_p4 = scmp.lt.s32.totalorder %s235_s13, %s235_s13 }
  0x2a   :  { %181 = vmatpush3.bf16.msra.mxu0 %v178_v3 }
  0x2b   :  { %183 = vmatprep.subr.bf16.mxu0 %v182_v6  ;;  %p242_p5 = por %p241_p4, %p240_p3 }
  0x2d   :  { %p243_p6 = pnand %p242_p5, %p236_p2 }
  0x2e   :  { %185 = vmatpush3.bf16.msra.mxu0 %v182_v6 }
  0x31   :  { %176 = vmatmul.mubr.msk.f32.vlgmr.msra.gmra.mrb[0].mxu0 %vm56_vm0, %v44_v7 }
 0x104   :  { %v177_v9 = vpop.f32.mrb[0].mxu0 }
 0x105   :  { %v135_v10 = vadd.f32 %v177_v9, %v158_v8  ;;  %v129_v11 = vpop.f32.mrb[1].mxu0 }
 0x106   :  { %v130_v12 = vadd.f32 %v158_v8, %v129_v11 }
 0x107   :  { %139 = vst.msk [vmem:[#allocation7 + $0x8] sm:$0xff] %vm56_vm0, %v135_v10 }
 0x108   :  { %138 = vst.msk [vmem:[#allocation7] sm:$0xff] %vm56_vm0, %v130_v12 }
 0x109   :  { %246 = shalt.err (!%p243_p6)
}
 0x10a   :  { %s247_s15 = scalar_lea.hbm %s343_s3, 256 }
 0x10b   :  { %p248_p7 = scmp.ne.s32.totalorder %s343_s3, %s247_s15  ;;  %p251_p8 = scmp.lt.u32.totalorder %s247_s15, %s343_s3 }
 0x10d   :  { %p253_p9 = pnand %p251_p8, %p248_p7 }
 0x10f   :  { %256 = shalt.err (!%p253_p9)
}
 0x110   :  { %151 = dma.vmem_to_hbm [thread:$0]  %s146_s12, 256, %s343_s3, [#allocation4], %s264_s22, %s264_s22, %s265_s23  }
 0x111   :  { %261 = dma.done.wait [#allocation4], 256  }
 0x112   :  { %262 = vsyncadd [#allocation4], 4294967040 }
 0x113   :  { %155 = vsyncpa [#allocation3], 1 }
 0x114   :  { %156 = vsyncpa [#allocation6], 1 }
 0x115   :  { %157 = vsyncpa [#allocation4], 1 }

</bundles_post_ra>
